<compile_context>
chip_gen: v7x
topology: tpu7x:2x2x1
jax: 0.10.0
libtpu: 0.0.40
codegen_flags: <defaults>
</compile_context>

<pallas_src>
import functools

import jax
import jax.numpy as jnp
from jax.experimental import pallas as pl
from jax.experimental.pallas import tpu as pltpu


# Z-parity masks over the 8 three-qubit computational-basis states
# (same sign convention as the PyTorch module).
_MASKS = (
    (-1.0, 1.0, -1.0, 1.0, -1.0, 1.0, -1.0, 1.0),      # Z0
    (-1.0, -1.0, 1.0, 1.0, -1.0, -1.0, 1.0, 1.0),      # Z1
    (-1.0, -1.0, -1.0, -1.0, 1.0, 1.0, 1.0, 1.0),      # Z2
    (-1.0, 1.0, 1.0, -1.0, 1.0, -1.0, -1.0, 1.0),      # Z0*Z1*Z2
)
_NUM_OUT = 4                 # expectation values per sample
_NUM_BASIS = 8               # basis-state probabilities per sample
_GROUPS = 16                 # samples packed per 128-lane input row
_IN_LANES = _GROUPS * _NUM_BASIS    # 128
_OUT_LANES = _GROUPS * _NUM_OUT     # 64


def _round_up(n, m):
    return ((n + m - 1) // m) * m


def _cdiv(a, b):
    return -(-a // b)


def _exp_val_kernel(x_ref, p_ref, b_ref, o_ref):
    # x_ref: (TILE_R, 128)  16 samples per row, 8 basis-state probs each.
    # p_ref: (128, 64)      block-diag projector: P[8g+j, 4g+a] = 0.5*w[a]*m[a,j]
    # b_ref: (1, 64)        bias: 0.5*w[a], tiled over the 16 sample groups.
    # o_ref: (TILE_R, 64)   16 samples per row, 4 expectation values each.
    #
    # One full-width MXU dot + a broadcast bias add; the kernel stays purely
    # HBM-bandwidth bound (~48 B / ~36 FLOPs per sample).
    o_ref[...] = (
        jnp.dot(x_ref[...], p_ref[...], preferred_element_type=jnp.float32)
        + b_ref[...]
    )


@functools.partial(jax.jit, static_argnames=("tile_r", "grid_steps"))
def _exp_val_pallas(x, w, tile_r, grid_steps):
    """x: (B, 8) f32 probabilities  ->  (B, 4) = w * ((x @ mask.T + 1) / 2)."""
    b = x.shape[0]
    bp = grid_steps * tile_r * _GROUPS
    if bp != b:
        x = jnp.pad(x, ((0, bp - b), (0, 0)))
    # Free contiguous reshape: 16 samples per lane-dense 128-wide row.
    x_rows = x.reshape(bp // _GROUPS, _IN_LANES)

    # Fold the affine into the contraction:
    #   w * ((s + 1) / 2)  ==  x @ (0.5*w*mask).T + 0.5*w
    mask = jnp.asarray(_MASKS, jnp.float32)                       # (4, 8)
    wm = 0.5 * w[:, None] * mask                                  # (4, 8)
    eye = jnp.eye(_GROUPS, dtype=jnp.float32)                     # (16, 16)
    # p[8g + j, 4h + a] = eye[g, h] * wm[a, j]
    p = (eye[:, None, :, None] * wm.T[None, :, None, :]).reshape(
        _IN_LANES, _OUT_LANES)                                    # (128, 64)
    bias = jnp.tile(0.5 * w, _GROUPS).reshape(1, _OUT_LANES)      # (1, 64)

    rows = bp // _GROUPS
    bytes_accessed = rows * (_IN_LANES + _OUT_LANES) * 4 + (p.size + bias.size) * 4

    out_rows = pl.pallas_call(
        _exp_val_kernel,
        out_shape=jax.ShapeDtypeStruct((rows, _OUT_LANES), jnp.float32),
        grid=(grid_steps,),
        in_specs=[
            pl.BlockSpec((tile_r, _IN_LANES), lambda i: (i, 0)),
            pl.BlockSpec((_IN_LANES, _OUT_LANES), lambda i: (0, 0)),  # resident
            pl.BlockSpec((1, _OUT_LANES), lambda i: (0, 0)),          # resident
        ],
        out_specs=pl.BlockSpec((tile_r, _OUT_LANES), lambda i: (i, 0)),
        compiler_params=pltpu.CompilerParams(
            dimension_semantics=("parallel",)),       # megacore sharding (v7x)
        cost_estimate=pl.CostEstimate(
            flops=36 * bp, transcendentals=0, bytes_accessed=bytes_accessed),
    )(x_rows, p, bias)

    # Free contiguous reshape back to the module's (B, 4) layout.
    return out_rows.reshape(bp, _NUM_OUT)[:b]


def make_exp_val_layer(action_space=4, seed=0, tile_b=65536,
                       min_pallas_batch=8192):
    """Returns (weights, forward_fn) mimicking the PyTorch exp_val_layer."""
    if action_space != 4:
        raise ValueError(
            "exp_val_layer.forward always produces 4 expectation values "
            "(Z0, Z1, Z2, Z0Z1Z2); action_space must be 4.")

    key = jax.random.PRNGKey(seed)
    # torch.nn.init.uniform_(weights, 35, 40), deterministic via PRNGKey.
    weights = jax.random.uniform(
        key, (action_space,), dtype=jnp.float32, minval=35.0, maxval=40.0)

    mask = jnp.asarray(_MASKS, jnp.float32)          # (4, 8)
    tile_target = max(128, _round_up(int(tile_b), 128))

    def _small(x, w):
        # Tiny / RL-inference batches: ~50 FLOPs/sample — let XLA fuse this
        # with the upstream QNN instead of paying pallas_call launch + DMA.
        s = jnp.einsum("bj,aj->ba", x, mask,
                       precision=jax.lax.Precision.HIGHEST)
        return 0.5 * w[None, :] * (s + 1.0)

    def _pallas(x, w):
        b = x.shape[0]
        # >= 2 grid steps (so v7x uses both TensorCores), tile forced to a
        # multiple of 128 samples, pad waste bounded to < 128 samples/step,
        # and double-buffered VMEM bounded by tile_b (~96 B/sample).
        g = max(2, _cdiv(b, tile_target))
        tile = _round_up(_cdiv(b, g), 128)
        return _exp_val_pallas(x, w, tile // _GROUPS, g)

    @jax.custom_vjp
    def _batched(x, w):
        return _pallas(x, w)

    def _batched_fwd(x, w):
        return _pallas(x, w), (x, w)

    def _batched_bwd(res, g_out):
        x, w = res
        s = jnp.einsum("bj,aj->ba", x, mask,
                       precision=jax.lax.Precision.HIGHEST)
        dw = 0.5 * jnp.sum(g_out * (s + 1.0), axis=0)
        dx = jnp.einsum("ba,aj->bj", g_out * (0.5 * w)[None, :], mask,
                        precision=jax.lax.Precision.HIGHEST)
        return dx, dw

    _batched.defvjp(_batched_fwd, _batched_bwd)

    def forward(x, w=None):
        w_ = weights if w is None else jnp.asarray(w, jnp.float32)
        x = jnp.asarray(x, jnp.float32)
        squeeze = x.ndim == 1
        if squeeze:
            x = x[None, :]
        if x.shape[0] < min_pallas_batch:
            out = _small(x, w_)
        else:
            out = _batched(x, w_)
        return out[0] if squeeze else out

    return weights, forward


def _reference(x, weights):
    # Faithful (elementwise multiply + sum, exact f32) port of the torch code.
    x = jnp.asarray(x, jnp.float32)
    squeeze = x.ndim == 1
    if squeeze:
        x = x[None, :]
    mask = jnp.asarray(_MASKS, jnp.float32)
    s = jnp.sum(mask[None, :, :] * x[:, None, :], axis=-1)       # (B, 4)
    out = weights[None, :] * ((s + 1.0) / 2.0)
    return out[0] if squeeze else out


if __name__ == "__main__":
    # Small tile / threshold so the demo exercises the Pallas path at
    # small deterministic shapes (production defaults are tile_b=65536,
    # min_pallas_batch=8192).
    weights, forward = make_exp_val_layer(
        action_space=4, seed=0, tile_b=1024, min_pallas_batch=512)

    key = jax.random.PRNGKey(0)

    # --- Tiny-batch / 1-D paths (typical RL usage; fused jnp fallback). ----
    x_small = jax.nn.softmax(
        jax.random.normal(key, (2, 8), dtype=jnp.float32), axis=-1)
    y_small = forward(x_small)
    jax.block_until_ready(y_small)
    assert y_small.shape == (2, 4)
    assert jnp.allclose(y_small, _reference(x_small, weights),
                        atol=1e-4, rtol=1e-5)

    y1 = forward(x_small[0])
    jax.block_until_ready(y1)
    assert y1.shape == (4,)
    assert jnp.allclose(y1, _reference(x_small[0], weights),
                        atol=1e-4, rtol=1e-5)

    # --- Pallas path: ragged batch (pad + slice, grid of 2 steps). ---------
    x_ragged = jax.nn.softmax(
        jax.random.normal(jax.random.PRNGKey(0), (1000, 8), jnp.float32),
        axis=-1)
    y_ragged = forward(x_ragged)
    jax.block_until_ready(y_ragged)
    assert y_ragged.shape == (1000, 4)
    # Loose atol tolerates any MXU f32 multi-pass accumulation differences.
    assert jnp.allclose(y_ragged, _reference(x_ragged, weights),
                        atol=5e-2, rtol=1e-3)

    # --- Pallas path: exact tile multiple (grid of 2 x 1024-sample steps). -
    x_big = jax.nn.softmax(
        jax.random.normal(jax.random.PRNGKey(1), (2048, 8), jnp.float32),
        axis=-1)
    y_big = forward(x_big)
    jax.block_until_ready(y_big)
    assert y_big.shape == (2048, 4)
    assert jnp.allclose(y_big, _reference(x_big, weights),
                        atol=5e-2, rtol=1e-3)

    # --- Gradient through the Pallas path (custom_vjp closed-form bwd). ----
    gw = jax.grad(lambda w: jnp.sum(forward(x_ragged, w)))(weights)
    gw_ref = jax.grad(lambda w: jnp.sum(_reference(x_ragged, w)))(weights)
    jax.block_until_ready(gw)
    assert jnp.allclose(gw, gw_ref, atol=1e-2, rtol=1e-4)

    print("KERNEL_OK")
</pallas_src>

<mosaic_0001>
module attributes {stable_mosaic.version = 11 : i64} {
  func.func @_exp_val_kernel(%arg0: i32, %arg1: memref<32x128xf32, #tpu.memory_space<vmem>>, %arg2: memref<128x64xf32, #tpu.memory_space<vmem>>, %arg3: memref<1x64xf32, #tpu.memory_space<vmem>>, %arg4: memref<32x64xf32, #tpu.memory_space<vmem>>) attributes {dimension_semantics = [#tpu.dimension_semantics<parallel>], iteration_bounds = array<i64: 2>, scalar_prefetch = 0 : i64, scratch_operands = 0 : i64, tpu.core_type = #tpu.core_type<tc>, window_params = [{transform_indices = @transform_0, window_bounds = array<i64: 32, 128>}, {pipeline_mode = #tpu.pipeline_mode<synchronous>, transform_indices = @transform_1, window_bounds = array<i64: 128, 64>}, {pipeline_mode = #tpu.pipeline_mode<synchronous>, transform_indices = @transform_2, window_bounds = array<i64: 1, 64>}, {transform_indices = @transform_3, window_bounds = array<i64: 32, 64>}]} {
    %c0 = arith.constant 0 : index
    %c0_0 = arith.constant 0 : index
    %0 = vector.load %arg1[%c0, %c0_0] : memref<32x128xf32, #tpu.memory_space<vmem>>, vector<32x128xf32>
    %c0_1 = arith.constant 0 : index
    %c0_2 = arith.constant 0 : index
    %1 = vector.load %arg2[%c0_1, %c0_2] : memref<128x64xf32, #tpu.memory_space<vmem>>, vector<128x64xf32>
    %cst = arith.constant dense<0.000000e+00> : vector<32x64xf32>
    %2 = tpu.matmul %0, %1, %cst {dimension_numbers = #tpu.dot_dimension_numbers<[1], [0], [0], [1], [0, 0, 1, 1], [], []>} : vector<32x128xf32>, vector<128x64xf32>, vector<32x64xf32> -> vector<32x64xf32>
    %c0_3 = arith.constant 0 : index
    %c0_4 = arith.constant 0 : index
    %3 = vector.load %arg3[%c0_3, %c0_4] : memref<1x64xf32, #tpu.memory_space<vmem>>, vector<1x64xf32>
    %4 = vector.broadcast %3 : vector<1x64xf32> to vector<32x64xf32>
    %5 = arith.addf %2, %4 : vector<32x64xf32>
    %c0_5 = arith.constant 0 : index
    %c0_6 = arith.constant 0 : index
    %6 = vector.load %arg4[%c0_5, %c0_6] : memref<32x64xf32, #tpu.memory_space<vmem>>, vector<32x64xf32>
    tpu.vector_store %arg4[%c0_5, %c0_6], %5 {strides = array<i32>} : memref<32x64xf32, #tpu.memory_space<vmem>>, vector<32x64xf32>,
    return
  }
  func.func @transform_0(%arg0: i32) -> (i32, i32) {
    %c0_i32 = arith.constant 0 : i32
    %c0_i32_0 = arith.constant 0 : i32
    return %arg0, %c0_i32 : i32, i32
  }
  func.func @transform_1(%arg0: i32) -> (i32, i32) {
    %c0_i32 = arith.constant 0 : i32
    %c0_i32_0 = arith.constant 0 : i32
    %c0_i32_1 = arith.constant 0 : i32
    return %c0_i32, %c0_i32_0 : i32, i32
  }
  func.func @transform_2(%arg0: i32) -> (i32, i32) {
    %c0_i32 = arith.constant 0 : i32
    %c0_i32_0 = arith.constant 0 : i32
    %c0_i32_1 = arith.constant 0 : i32
    return %c0_i32, %c0_i32_0 : i32, i32
  }
  func.func @transform_3(%arg0: i32) -> (i32, i32) {
    %c0_i32 = arith.constant 0 : i32
    %c0_i32_0 = arith.constant 0 : i32
    return %arg0, %c0_i32 : i32, i32
  }
}

</mosaic_0001>

<bundles_post_ra>
// kernel: tile.8
= control target key start
LH: loop header
LB: loop body
LE: loop exit
PB: predicated region body
PF: predicated region fallthrough
CT: control target
= control target key end

     0   :  { %s28_s0 = inlined_call_operand.vmem [shape: f32[4], index: 0, kind: input, shape index: {}]   ;;  %s29_s1 = inlined_call_operand.vmem [shape: f32[16,4], index: 1, kind: output, shape index: {}]  }
   0x1   :  { %v4_v0 = vld [vmem:[%s28_s0] ss:$0 sm:$0xff] }
   0x2   :  { %5 = vst [vmem:[%s29_s1] sm:$0xff] %v4_v0  ;;  %8 = vst [vmem:[%s29_s1 + $0x8] sm:$0xff] %v4_v0 }

// kernel: tile.9
= control target key start
LH: loop header
LB: loop body
LE: loop exit
PB: predicated region body
PF: predicated region fallthrough
CT: control target
= control target key end

     0   :  { %s131_s10 = smov 60   ;;  %s132_s11 = smov 52   ;;  %vm3_vm0 = vcmask 31744   ;;  %vm9_vm1 = vcmask 523744   ;;  %vm15_vm2 = vcmask 490944   ;;  %vm21_vm3 = vcmask 458144   ;;  %s207_s0 = inlined_call_operand.vmem [shape: f32[16,4], index: 0, kind: input, shape index: {}]   ;;  %s208_s1 = inlined_call_operand.vmem [shape: f32[1,64], index: 1, kind: output, shape index: {}]  }
   0x1   :  { %v101_v0 = vld [vmem:[%s207_s0 + $0xf] sm:$0x1]   ;;  %v103_v1 = vld [vmem:[%s207_s0 + $0xd] sm:$0x1]   ;;  %v102_v2 = vld [vmem:[%s207_s0 + $0xe] sm:$0x1]  }
   0x2   :  { %7 = vrot.lane.b32.xlu0 %v101_v0, %s131_s10  ;;  %19 = vrot.lane.b32.xlu1 %v103_v1, %s132_s11  ;;  %v104_v3 = vld [vmem:[%s207_s0 + $0xc] sm:$0x1]   ;;  %s133_s16 = smov 56   ;;  %s134_s17 = smov 48   ;;  %v105_v4 = vld [vmem:[%s207_s0 + $0xb] sm:$0x1]  }
   0x3   :  { %v106_v5 = vld [vmem:[%s207_s0 + $0xa] sm:$0x1]   ;;  %v2_v6 = vld [vmem:[%s207_s0] sm:$0x1]   ;;  %s135_s24 = smov 44   ;;  %s136_s25 = smov 40  }
   0x4   :  { %4 = vst.msk [vmem:[#allocation0] sm:$0x1] %vm3_vm0, %v2_v6   ;;  %v107_v7 = vld [vmem:[%s207_s0 + $0x9] sm:$0x1]   ;;  %v108_v8 = vld [vmem:[%s207_s0 + $0x8] sm:$0x1]  }
   0x5   :  { %s137_s30 = smov 36   ;;  %s138_s2 = smov 32   ;;  %v109_v9 = vld [vmem:[%s207_s0 + $0x7] sm:$0x1]   ;;  %v110_v10 = vld [vmem:[%s207_s0 + $0x6] sm:$0x1]  }
   0x6   :  { %13 = vrot.lane.b32.xlu0 %v102_v2, %s133_s16  ;;  %25 = vrot.lane.b32.xlu1 %v104_v3, %s134_s17  ;;  %s139_s7 = smov 28   ;;  %s140_s8 = smov 24   ;;  %v111_v11 = vld [vmem:[%s207_s0 + $0x5] sm:$0x1]   ;;  %v112_v12 = vld [vmem:[%s207_s0 + $0x4] sm:$0x1]  }
   0x7   :  { %s141_s13 = smov 20   ;;  %s142_s14 = smov 16   ;;  %v113_v13 = vld [vmem:[%s207_s0 + $0x3] sm:$0x1]   ;;  %v114_v14 = vld [vmem:[%s207_s0 + $0x2] sm:$0x1]  }
   0x8   :  { %s143_s19 = smov 12   ;;  %s144_s20 = smov 8   ;;  %v115_v15 = vld [vmem:[%s207_s0 + $0x1] sm:$0x1]   ;;  %vm27_vm4 = vcmask 425344   ;;  %vm33_vm5 = vcmask 392544  }
   0x9   :  { %s145_s0 = smov 4   ;;  %vm39_vm6 = vcmask 359744   ;;  %vm45_vm7 = vcmask 326944   ;;  %vm51_vm8 = vcmask 294144   ;;  %vm57_vm9 = vcmask 261344  }
   0xa   :  { %31 = vrot.lane.b32.xlu0 %v105_v4, %s135_s24  ;;  %37 = vrot.lane.b32.xlu1 %v106_v5, %s136_s25  ;;  %vm63_vm10 = vcmask 228544   ;;  %vm69_vm11 = vcmask 195744   ;;  %vm75_vm12 = vcmask 162944   ;;  %vm81_vm13 = vcmask 130144  }
   0xb   :  { %vm87_vm14 = vcmask 97344   ;;  %vm93_vm15 = vcmask 64544  }
   0xe   :  { %43 = vrot.lane.b32.xlu0 %v107_v7, %s137_s30  ;;  %49 = vrot.lane.b32.xlu1 %v108_v8, %s138_s2 }
  0x12   :  { %55 = vrot.lane.b32.xlu0 %v109_v9, %s139_s7  ;;  %61 = vrot.lane.b32.xlu1 %v110_v10, %s140_s8 }
  0x16   :  { %67 = vrot.lane.b32.xlu0 %v111_v11, %s141_s13  ;;  %73 = vrot.lane.b32.xlu1 %v112_v12, %s142_s14 }
  0x1a   :  { %79 = vrot.lane.b32.xlu0 %v113_v13, %s143_s19  ;;  %85 = vrot.lane.b32.xlu1 %v114_v14, %s144_s20 }
  0x1e   :  { %91 = vrot.lane.b32.xlu0 %v115_v15, %s145_s0 }
  0x74   :  { %v8_v16 = vpop.permute.xlu0 %7   ;;  %v20_v17 = vpop.permute.xlu1 %19  }
  0x75   :  { %10 = vst.msk [vmem:[#allocation0] sm:$0x1] %vm9_vm1, %v8_v16  }
  0x78   :  { %v14_v18 = vpop.permute.xlu0 %13   ;;  %v26_v19 = vpop.permute.xlu1 %25  }
  0x79   :  { %16 = vst.msk [vmem:[#allocation0] sm:$0x1] %vm15_vm2, %v14_v18  }
  0x7a   :  { %22 = vst.msk [vmem:[#allocation0] sm:$0x1] %vm21_vm3, %v20_v17  }
  0x7b   :  { %28 = vst.msk [vmem:[#allocation0] sm:$0x1] %vm27_vm4, %v26_v19  }
  0x7c   :  { %v32_v20 = vpop.permute.xlu0 %31   ;;  %v38_v21 = vpop.permute.xlu1 %37  }
  0x7d   :  { %34 = vst.msk [vmem:[#allocation0] sm:$0x1] %vm33_vm5, %v32_v20  }
  0x7e   :  { %40 = vst.msk [vmem:[#allocation0] sm:$0x1] %vm39_vm6, %v38_v21  }
  0x80   :  { %v44_v22 = vpop.permute.xlu0 %43   ;;  %v50_v23 = vpop.permute.xlu1 %49  }
  0x81   :  { %46 = vst.msk [vmem:[#allocation0] sm:$0x1] %vm45_vm7, %v44_v22  }
  0x82   :  { %52 = vst.msk [vmem:[#allocation0] sm:$0x1] %vm51_vm8, %v50_v23  }
  0x84   :  { %v56_v24 = vpop.permute.xlu0 %55   ;;  %v62_v25 = vpop.permute.xlu1 %61  }
  0x85   :  { %58 = vst.msk [vmem:[#allocation0] sm:$0x1] %vm57_vm9, %v56_v24  }
  0x86   :  { %64 = vst.msk [vmem:[#allocation0] sm:$0x1] %vm63_vm10, %v62_v25  }
  0x88   :  { %v68_v26 = vpop.permute.xlu0 %67   ;;  %v74_v27 = vpop.permute.xlu1 %73  }
  0x89   :  { %70 = vst.msk [vmem:[#allocation0] sm:$0x1] %vm69_vm11, %v68_v26  }
  0x8a   :  { %76 = vst.msk [vmem:[#allocation0] sm:$0x1] %vm75_vm12, %v74_v27  }
  0x8c   :  { %v80_v28 = vpop.permute.xlu0 %79   ;;  %v86_v29 = vpop.permute.xlu1 %85  }
  0x8d   :  { %82 = vst.msk [vmem:[#allocation0] sm:$0x1] %vm81_vm13, %v80_v28  }
  0x8e   :  { %88 = vst.msk [vmem:[#allocation0] sm:$0x1] %vm87_vm14, %v86_v29  }
  0x90   :  { %v92_v30 = vpop.permute.xlu0 %91  }
  0x91   :  { %94 = vst.msk [vmem:[#allocation0] sm:$0x1] %vm93_vm15, %v92_v30  }
  0x98   :  { %v98_v31 = vld [vmem:[#allocation0] sm:$0x1] }
  0x99   :  { %100 = vst [vmem:[%s208_s1] sm:$0x1] %v98_v31 }

// kernel: _exp_val_pallas.1
= control target key start
LH: loop header
LB: loop body
LE: loop exit
PB: predicated region body
PF: predicated region fallthrough
CT: control target
= control target key end

     0   :  { %s501_s12 = smov 0   ;;  %s582_s0 = inlined_call_operand.vmem [shape: f32[64,128], index: 0, kind: input, shape index: {}]   ;;  %s583_s1 = inlined_call_operand.vmem [shape: f32[128,64], index: 1, kind: input, shape index: {}]   ;;  %s584_s2 = inlined_call_operand.vmem [shape: f32[1,64], index: 2, kind: input, shape index: {}]   ;;  %s585_s3 = inlined_call_operand.vmem [shape: f32[64,64], index: 3, kind: output, shape index: {}]  }
   0x1 LB: > { %s347_s13 = sadd.s32 4294967295, %s479_s12   ;;  %p351_p0 = scmp.ge.s32.totalorder %s479_s12, 1  ;;  %s479_s12 = sphi %s501_s12, %s13_s12  }
   0x2   : > { %p138_p1 = scmp.lt.s32.totalorder %s479_s12, 3 }
   0x4   : > { %p139_p2 = pnand %p351_p0, %p138_p1 }
   0x5   : > { %v178_v0 = vld [vmem:[%s583_s1] sm:$0xff] (!%p139_p2)  ;;  %v179_v1 = vld [vmem:[%s583_s1 + $0x8] sm:$0xff] (!%p139_p2)  ;;  %v180_v2 = vld [vmem:[%s583_s1 + $0x10] sm:$0xff] (!%p139_p2)  ;;  %s352_s20 = sshll.u32 (!%p139_p2), %s347_s13, 2  ;;  %vm286_vm0 = vcmask (!%p139_p2), 523264  }
   0x6   : > { %142 = sbr.rel (%p139_p2) target bundleno = 257 (0x101), region = 32  ;;  %v417_v3 = vpack.c.bf16 (!%p139_p2), %v179_v1, %v178_v0  ;;  %v181_v4 = vld [vmem:[%s583_s1 + $0x18] sm:$0xff] (!%p139_p2)  ;;  %p163_p3 = scmp.lt.s32.totalorder (!%p139_p2), %s352_s20, 7  ;;  %v182_v6 = vld [vmem:[%s583_s1 + $0x20] sm:$0xff] (!%p139_p2)  ;;  %v183_v7 = vld [vmem:[%s583_s1 + $0x28] sm:$0xff] (!%p139_p2) }
   0x7   : > { %v421_v5 = vpack.c.bf16 (!%p139_p2), %v181_v4, %v180_v2  ;;  %v425_v8 = vpack.c.bf16 (!%p139_p2), %v183_v7, %v182_v6  ;;  %v184_v9 = vld [vmem:[%s583_s1 + $0x30] sm:$0xff] (!%p139_p2)  ;;  %v185_v10 = vld [vmem:[%s583_s1 + $0x38] sm:$0xff] (!%p139_p2)  ;;  %v186_v14 = vld [vmem:[%s583_s1 + $0x40] sm:$0xff] (!%p139_p2) }
   0x8   : > { %418 = vmatprep.subr.bf16.mxu0 (!%p139_p2), %v417_v3  ;;  %449 = vmatprep.subr.bf16.mxu1 (!%p139_p2), %v417_v3  ;;  %v429_v13 = vpack.c.bf16 (!%p139_p2), %v185_v10, %v184_v9  ;;  %v187_v15 = vld [vmem:[%s583_s1 + $0x48] sm:$0xff] (!%p139_p2)  ;;  %v188_v17 = vld [vmem:[%s583_s1 + $0x50] sm:$0xff] (!%p139_p2)  ;;  %v189_v18 = vld [vmem:[%s583_s1 + $0x58] sm:$0xff] (!%p139_p2) }
   0x9   : > { %420 = vmatpush3.bf16.msra.mxu0 (!%p139_p2), %v417_v3  ;;  %457 = vmatpush3.bf16.msra.mxu1 (!%p139_p2), %v417_v3  ;;  %v433_v16 = vpack.c.bf16 (!%p139_p2), %v187_v15, %v186_v14  ;;  %v437_v19 = vpack.c.bf16 (!%p139_p2), %v189_v18, %v188_v17  ;;  %v190_v20 = vld [vmem:[%s583_s1 + $0x60] sm:$0xff] (!%p139_p2)  ;;  %v191_v21 = vld [vmem:[%s583_s1 + $0x68] sm:$0xff] (!%p139_p2)  ;;  %v192_v23 = vld [vmem:[%s583_s1 + $0x70] sm:$0xff] (!%p139_p2) }
   0xa   : > { %422 = vmatprep.subr.bf16.mxu0 (!%p139_p2), %v421_v5  ;;  %450 = vmatprep.subr.bf16.mxu1 (!%p139_p2), %v421_v5  ;;  %v441_v22 = vpack.c.bf16 (!%p139_p2), %v191_v21, %v190_v20  ;;  %v193_v24 = vld [vmem:[%s583_s1 + $0x78] sm:$0xff] (!%p139_p2)  ;;  %v356_v28 = vld [vmem:[%s584_s2] ss:$0 sm:$0xff] (!%p139_p2) }
   0xb   : > { %v445_v25 = vpack.c.bf16 (!%p139_p2), %v193_v24, %v192_v23 }
   0xd   : > { %s587_s20 = smov (!%p163_p3, %s352_s20), 7  ;;  %424 = vmatpush3.bf16.msra.mxu0 %v421_v5  ;;  %458 = vmatpush3.bf16.msra.mxu1 %v421_v5 }
   0xe   : > { %s353_s27 = sshll.u32 %s587_s20, 3  ;;  %426 = vmatprep.subr.bf16.mxu0 %v425_v8  ;;  %451 = vmatprep.subr.bf16.mxu1 %v425_v8 }
   0xf   : > { %s541_s7 = scalar_lea.vmem %s582_s0, %s353_s27  ;;  %s172_s4 = scalar_lea.vmem %s585_s3, %s353_s27 }
  0x10   : > { %v174_v11 = vld [vmem:[%s541_s7] sm:$0xff]  ;;  %v176_v12 = vld [vmem:[%s541_s7 + $0x10] sm:$0xff]  ;;  %v175_v26 = vld [vmem:[%s541_s7 + $0x8] sm:$0xff] }
  0x11   : > { %411 = vmatprep.mubr.f32.mxu0 %v174_v11  ;;  %414 = vmatprep.mubr.f32.mxu1 %v176_v12  ;;  %v177_v27 = vld [vmem:[%s541_s7 + $0x18] sm:$0xff] }
  0x12   : > { %428 = vmatpush3.bf16.msra.mxu0 %v425_v8  ;;  %459 = vmatpush3.bf16.msra.mxu1 %v425_v8 }
  0x13   : > { %430 = vmatprep.subr.bf16.mxu0 %v429_v13  ;;  %452 = vmatprep.subr.bf16.mxu1 %v429_v13 }
  0x16   : > { %432 = vmatpush3.bf16.msra.mxu0 %v429_v13  ;;  %460 = vmatpush3.bf16.msra.mxu1 %v429_v13 }
  0x17   : > { %434 = vmatprep.subr.bf16.mxu0 %v433_v16  ;;  %453 = vmatprep.subr.bf16.mxu1 %v433_v16 }
  0x1a   : > { %436 = vmatpush3.bf16.msra.mxu0 %v433_v16  ;;  %461 = vmatpush3.bf16.msra.mxu1 %v433_v16 }
  0x1b   : > { %438 = vmatprep.subr.bf16.mxu0 %v437_v19  ;;  %454 = vmatprep.subr.bf16.mxu1 %v437_v19 }
  0x1e   : > { %440 = vmatpush3.bf16.msra.mxu0 %v437_v19  ;;  %462 = vmatpush3.bf16.msra.mxu1 %v437_v19 }
  0x1f   : > { %442 = vmatprep.subr.bf16.mxu0 %v441_v22  ;;  %455 = vmatprep.subr.bf16.mxu1 %v441_v22 }
  0x22   : > { %444 = vmatpush3.bf16.msra.mxu0 %v441_v22  ;;  %463 = vmatpush3.bf16.msra.mxu1 %v441_v22 }
  0x23   : > { %446 = vmatprep.subr.bf16.mxu0 %v445_v25  ;;  %456 = vmatprep.subr.bf16.mxu1 %v445_v25 }
  0x26   : > { %448 = vmatpush3.bf16.msra.mxu0 %v445_v25  ;;  %464 = vmatpush3.bf16.msra.mxu1 %v445_v25 }
  0x29   : > { %412 = vmatmul.mubr.f32.vlgmr.msra.gmra.mrb[0].mxu0 %v175_v26  ;;  %415 = vmatmul.mubr.f32.vlgmr.msra.gmra.mrb[0].mxu1 %v177_v27 }
  0xfc   : > { %v413_v29 = vpop.f32.mrb[0].mxu0  ;;  %v416_v30 = vpop.f32.mrb[0].mxu1 }
  0xfd   : > { %v267_v31 = vpop.f32.mrb[1].mxu0  ;;  %v277_v32 = vpop.f32.mrb[1].mxu1  ;;  %v273_v35 = vadd.f32 %v413_v29, %v356_v28  ;;  %v283_v36 = vadd.f32 %v416_v30, %v356_v28 }
  0xfe   : > { %v268_v33 = vadd.f32 %v356_v28, %v267_v31  ;;  %v278_v34 = vadd.f32 %v356_v28, %v277_v32 }
  0xff   : > { %288 = vst.msk [vmem:[%s172_s4 + $0x8] sm:$0xff] %vm286_vm0, %v273_v35  ;;  %290 = vst.msk [vmem:[%s172_s4 + $0x18] sm:$0xff] %vm286_vm0, %v283_v36 }
 0x100   : > { %287 = vst.msk [vmem:[%s172_s4] sm:$0xff] %vm286_vm0, %v268_v33  ;;  %289 = vst.msk [vmem:[%s172_s4 + $0x10] sm:$0xff] %vm286_vm0, %v278_v34 }
 0x101 PF: > { %s13_s12 = sadd.s32 1, %s479_s12  }
 0x102   : > { %p10_p4 = scmp.ge.s32.totalorder %s13_s12, 4  }
 0x104   :  { %12 = sbr.rel (!%p10_p4) target bundleno = 1 (0x1), region = 62 }

</bundles_post_ra>
